<compile_context>
chip_gen: v7x
topology: tpu7x:2x2x1
jax: 0.10.0
libtpu: 0.0.40
codegen_flags: <defaults>
</compile_context>

<pallas_src>
import jax
import jax.numpy as jnp
from jax.experimental import pallas as pl
from jax.experimental.pallas import tpu as pltpu

MASK_NEG = -1e30           # additive mask value (see header)
_TARGET_LANES = 512        # aim for ~512 lanes of transformEncoded per grid step
_MAX_BATCHES_PER_TILE = 8  # cap on the static per-tile batch unroll
_MAX_TILE_T = 512          # T-tile cap for the encoding kernel


def _batches_per_tile(B, T):
    """Whole batches per grid step: enough to reach ~_TARGET_LANES lanes, capped."""
    return max(1, min(B, _MAX_BATCHES_PER_TILE, _TARGET_LANES // max(T, 1)))


def _vmem_limit(nbytes_estimate):
    """Scoped-VMEM request with headroom, clamped to be safe on v7x (64 MiB physical)."""
    return int(max(32 * 1024 * 1024, min(64 * 1024 * 1024, nbytes_estimate)))


# ---------------------------------------------------------------------------
# Kernel A: PointerStandard.forwardEncoded
#   te[b, :, t] = W1 @ encoded[b, t, :]   stored bf16, layout (B, E, T)
# ---------------------------------------------------------------------------
def _encode_kernel(enc_ref, w1_ref, te_ref):
    # enc_ref: (NB, TILE_T, E) f32 ; w1_ref: (E, E) f32 ; te_ref: (NB, E, TILE_T) bf16
    nb = enc_ref.shape[0]
    w1 = w1_ref[...]
    for b in range(nb):                       # short static unroll (<= _MAX_BATCHES_PER_TILE)
        te = jax.lax.dot_general(             # W1 @ enc_b^T  (trans-B matmul on the MXU)
            w1, enc_ref[b],
            dimension_numbers=(((1,), (1,)), ((), ())),
            preferred_element_type=jnp.float32)
        te_ref[b] = te.astype(jnp.bfloat16)


def pointer_forward_encoded(params, encoded):
    """PointerStandard.forwardEncoded.

    Returns the cached transformEncoded in the kernel-internal layout (B, E, T),
    stored bfloat16; slab [b, :, t] holds W1 @ encoded[b, t, :].
    """
    B, T, E = encoded.shape
    nb = _batches_per_tile(B, T)
    tile_t = min(T, _MAX_TILE_T)
    grid = (pl.cdiv(B, nb), pl.cdiv(T, tile_t))

    encoded = encoded.astype(jnp.float32)
    w1 = params['W1'].astype(jnp.float32)

    est = (2 * 4 * nb * tile_t * E        # double-buffered f32 encoded tiles
           + 2 * 2 * nb * E * tile_t      # double-buffered bf16 output tiles
           + 4 * E * E                    # W1 (resident)
           + (1 << 20))
    return pl.pallas_call(
        _encode_kernel,
        out_shape=jax.ShapeDtypeStruct((B, E, T), jnp.bfloat16),
        grid=grid,
        in_specs=[
            pl.BlockSpec((nb, tile_t, E), lambda b, t: (b, t, 0)),
            pl.BlockSpec((E, E), lambda b, t: (0, 0)),
        ],
        out_specs=pl.BlockSpec((nb, E, tile_t), lambda b, t: (b, 0, t)),
        compiler_params=pltpu.CompilerParams(
            dimension_semantics=("parallel", "parallel"),
            vmem_limit_bytes=_vmem_limit(est)),
    )(encoded, w1)


# ---------------------------------------------------------------------------
# Kernel B: PointerStandard.forward
#   td_b    = W2 @ decoder_state[b]^T                     (E, 1)
#   z_b     = tanh(te[b] + td_b)      (VPU broadcast over the T lanes)
#   u_b     = vt @ z_b                                     (1, T)
#   out[b]  = masked_log_softmax(u_b / temperature, mask[b])
# ---------------------------------------------------------------------------
def _forward_kernel(te_ref, ds_ref, w2_ref, vt_ref, mask_ref, itemp_ref, out_ref):
    # te_ref:   (NB, E, T) bf16   cached transformEncoded slabs
    # ds_ref:   (NB, 1, E) f32    decoder state rows
    # w2_ref:   (E, E) f32 ; vt_ref: (1, E) f32
    # mask_ref: (NB, 1, T) f32 ; itemp_ref: (1, 1) f32 in SMEM
    # out_ref:  (NB, 1, T) f32    per-row masked log-softmax
    nb = te_ref.shape[0]
    w2 = w2_ref[...]
    vt = vt_ref[...]
    inv_temp = itemp_ref[0, 0]
    for b in range(nb):                       # short static unroll (<= _MAX_BATCHES_PER_TILE)
        td = jax.lax.dot_general(             # W2 @ ds_b^T -> (E, 1)
            w2, ds_ref[b],
            dimension_numbers=(((1,), (1,)), ((), ())),
            preferred_element_type=jnp.float32)
        # upcast bf16 -> f32 before the elementwise add / tanh (v5e has no bf16 VPU/EUP)
        z = jnp.tanh(te_ref[b].astype(jnp.float32) + td)            # (E, T)
        u = jnp.dot(vt, z, preferred_element_type=jnp.float32)      # (1, T)
        logits = u * inv_temp + jnp.where(mask_ref[b] > 0.0, 0.0, MASK_NEG)
        umax = jnp.max(logits, axis=-1, keepdims=True)
        lse = umax + jnp.log(jnp.sum(jnp.exp(logits - umax), axis=-1, keepdims=True))
        out_ref[b] = logits - lse                                    # whole-row lane slab


def pointer_forward(params, transform_encoded, decoder_state, mask=None,
                    temperature=1.0):
    """PointerStandard.forward; `transform_encoded` is the (B, E, T) bf16 cache from
    pointer_forward_encoded.  Returns log-scores of shape (B, T)."""
    B, E, T = transform_encoded.shape
    if mask is None:
        mask = jnp.ones((B, T), jnp.float32)
    mask = mask.astype(jnp.float32).reshape(B, 1, T)
    ds = decoder_state.astype(jnp.float32).reshape(B, 1, E)
    w2 = params['W2'].astype(jnp.float32)
    vt = params['vt'].astype(jnp.float32)
    # SMEM scalar; temperature may be a traced value. temperature == 0 -> inf (as torch).
    inv_temp = (1.0 / jnp.asarray(temperature, jnp.float32)).reshape(1, 1)

    nb = _batches_per_tile(B, T)
    grid = (pl.cdiv(B, nb),)
    est = (2 * 2 * nb * E * T            # double-buffered bf16 te tiles
           + 4 * E * T                   # f32 z intermediate
           + 4 * E * E + 4 * E           # W2, vt (resident)
           + 3 * 2 * 4 * nb * max(E, T)  # ds / mask / out tiles
           + (1 << 20))
    out = pl.pallas_call(
        _forward_kernel,
        out_shape=jax.ShapeDtypeStruct((B, 1, T), jnp.float32),
        grid=grid,
        in_specs=[
            pl.BlockSpec((nb, E, T), lambda b: (b, 0, 0)),
            pl.BlockSpec((nb, 1, E), lambda b: (b, 0, 0)),
            pl.BlockSpec((E, E), lambda b: (0, 0)),
            pl.BlockSpec((1, E), lambda b: (0, 0)),
            pl.BlockSpec((nb, 1, T), lambda b: (b, 0, 0)),
            pl.BlockSpec(memory_space=pltpu.MemorySpace.SMEM),
        ],
        out_specs=pl.BlockSpec((nb, 1, T), lambda b: (b, 0, 0)),
        compiler_params=pltpu.CompilerParams(
            dimension_semantics=("parallel",),
            vmem_limit_bytes=_vmem_limit(est)),
    )(transform_encoded, ds, w2, vt, mask, inv_temp)
    return out.reshape(B, T)


# ---------------------------------------------------------------------------
# Deterministic torch-default-like parameter init (nn.Linear, bias=False).
# Weights kept in torch (out, in) layout; the kernels contract the `in` axis directly.
# ---------------------------------------------------------------------------
def init_params(key, E):
    k1, k2, k3 = jax.random.split(key, 3)
    bound = 1.0 / (E ** 0.5)

    def lin(k, shape):
        return jax.random.uniform(k, shape, jnp.float32, -bound, bound)

    return dict(W1=lin(k1, (E, E)),      # PointerStandard.W1.weight
                W2=lin(k2, (E, E)),      # PointerStandard.W2.weight
                vt=lin(k3, (1, E)))      # PointerStandard.vt.weight


if __name__ == "__main__":
    B, T, E = 2, 8, 32
    key = jax.random.PRNGKey(0)
    kp, ke, kd = jax.random.split(key, 3)
    params = init_params(kp, E)
    encoded = jax.random.normal(ke, (B, T, E), jnp.float32)
    decoder_state = jax.random.normal(kd, (B, E), jnp.float32)
    # Mask a couple of already-chosen tokens, as a pointer network would.
    mask = jnp.ones((B, T), jnp.float32).at[0, 3].set(0.0).at[1, 0].set(0.0)

    # forwardEncoded (cached, bf16, (B, E, T)) then forward
    te = pointer_forward_encoded(params, encoded)
    log_scores = pointer_forward(params, te, decoder_state, mask, temperature=1.0)
    jax.block_until_ready(log_scores)
    assert log_scores.shape == (B, T)

    # pure-JAX reference (mirrors the bf16 storage of the cached transformEncoded)
    hp = jax.lax.Precision.HIGHEST
    te_ref = jnp.einsum('bte,fe->btf', encoded, params['W1'], precision=hp)
    te_ref = te_ref.astype(jnp.bfloat16).astype(jnp.float32)
    td_ref = jnp.einsum('be,fe->bf', decoder_state, params['W2'], precision=hp)
    u_ref = jnp.einsum('bte,e->bt', jnp.tanh(te_ref + td_ref[:, None, :]),
                       params['vt'][0], precision=hp)
    logits_ref = u_ref / 1.0 + jnp.where(mask > 0, 0.0, MASK_NEG)
    ref = jax.nn.log_softmax(logits_ref, axis=1)

    max_err = float(jnp.max(jnp.abs(log_scores - ref)))
    assert bool(jnp.all(jnp.isfinite(log_scores))), "non-finite log-scores"
    assert max_err < 2e-2, f"max abs diff {max_err}"
    print("KERNEL_OK")
</pallas_src>

<mosaic_0001>
module attributes {stable_mosaic.version = 11 : i64} {
  func.func @_encode_kernel(%arg0: i32, %arg1: i32, %arg2: memref<2x8x32xf32, #tpu.memory_space<vmem>>, %arg3: memref<32x32xf32, #tpu.memory_space<vmem>>, %arg4: memref<2x32x8xbf16, #tpu.memory_space<vmem>>) attributes {dimension_semantics = [#tpu.dimension_semantics<parallel>, #tpu.dimension_semantics<parallel>], iteration_bounds = array<i64: 1, 1>, scalar_prefetch = 0 : i64, scratch_operands = 0 : i64, tpu.core_type = #tpu.core_type<tc>, window_params = [{transform_indices = @transform_0, window_bounds = array<i64: 2, 8, 32>}, {pipeline_mode = #tpu.pipeline_mode<synchronous>, transform_indices = @transform_1, window_bounds = array<i64: 32, 32>}, {transform_indices = @transform_2, window_bounds = array<i64: 2, 32, 8>}]} {
    %c0 = arith.constant 0 : index
    %c0_0 = arith.constant 0 : index
    %0 = vector.load %arg3[%c0, %c0_0] : memref<32x32xf32, #tpu.memory_space<vmem>>, vector<32x32xf32>
    %c0_1 = arith.constant 0 : index
    %c0_2 = arith.constant 0 : index
    %c0_3 = arith.constant 0 : index
    %1 = vector.load %arg2[%c0_1, %c0_2, %c0_3] : memref<2x8x32xf32, #tpu.memory_space<vmem>>, vector<1x8x32xf32>
    %2 = vector.shape_cast %1 : vector<1x8x32xf32> to vector<8x32xf32>
    %cst = arith.constant dense<0.000000e+00> : vector<32x8xf32>
    %3 = tpu.matmul %0, %2, %cst {dimension_numbers = #tpu.dot_dimension_numbers<[1], [1], [0], [0], [0, 0, 1, 0], [], []>} : vector<32x32xf32>, vector<8x32xf32>, vector<32x8xf32> -> vector<32x8xf32>
    %4 = arith.truncf %3 : vector<32x8xf32> to vector<32x8xbf16>
    %c0_4 = arith.constant 0 : index
    %c0_5 = arith.constant 0 : index
    %c0_6 = arith.constant 0 : index
    %5 = vector.load %arg4[%c0_4, %c0_5, %c0_6] : memref<2x32x8xbf16, #tpu.memory_space<vmem>>, vector<1x32x8xbf16>
    %6 = vector.shape_cast %5 : vector<1x32x8xbf16> to vector<32x8xbf16>
    %7 = vector.shape_cast %4 : vector<32x8xbf16> to vector<1x32x8xbf16>
    tpu.vector_store %arg4[%c0_4, %c0_5, %c0_6], %7 {strides = array<i32>} : memref<2x32x8xbf16, #tpu.memory_space<vmem>>, vector<1x32x8xbf16>,
    %c1 = arith.constant 1 : index
    %c0_7 = arith.constant 0 : index
    %c0_8 = arith.constant 0 : index
    %8 = vector.load %arg2[%c1, %c0_7, %c0_8] : memref<2x8x32xf32, #tpu.memory_space<vmem>>, vector<1x8x32xf32>
    %9 = vector.shape_cast %8 : vector<1x8x32xf32> to vector<8x32xf32>
    %cst_9 = arith.constant dense<0.000000e+00> : vector<32x8xf32>
    %10 = tpu.matmul %0, %9, %cst_9 {dimension_numbers = #tpu.dot_dimension_numbers<[1], [1], [0], [0], [0, 0, 1, 0], [], []>} : vector<32x32xf32>, vector<8x32xf32>, vector<32x8xf32> -> vector<32x8xf32>
    %11 = arith.truncf %10 : vector<32x8xf32> to vector<32x8xbf16>
    %c1_10 = arith.constant 1 : index
    %c0_11 = arith.constant 0 : index
    %c0_12 = arith.constant 0 : index
    %12 = vector.load %arg4[%c1_10, %c0_11, %c0_12] : memref<2x32x8xbf16, #tpu.memory_space<vmem>>, vector<1x32x8xbf16>
    %13 = vector.shape_cast %12 : vector<1x32x8xbf16> to vector<32x8xbf16>
    %14 = vector.shape_cast %11 : vector<32x8xbf16> to vector<1x32x8xbf16>
    tpu.vector_store %arg4[%c1_10, %c0_11, %c0_12], %14 {strides = array<i32>} : memref<2x32x8xbf16, #tpu.memory_space<vmem>>, vector<1x32x8xbf16>,
    return
  }
  func.func @transform_0(%arg0: i32, %arg1: i32) -> (i32, i32, i32) {
    %c0_i32 = arith.constant 0 : i32
    %c0_i32_0 = arith.constant 0 : i32
    return %arg0, %arg1, %c0_i32 : i32, i32, i32
  }
  func.func @transform_1(%arg0: i32, %arg1: i32) -> (i32, i32) {
    %c0_i32 = arith.constant 0 : i32
    %c0_i32_0 = arith.constant 0 : i32
    %c0_i32_1 = arith.constant 0 : i32
    return %c0_i32, %c0_i32_0 : i32, i32
  }
  func.func @transform_2(%arg0: i32, %arg1: i32) -> (i32, i32, i32) {
    %c0_i32 = arith.constant 0 : i32
    %c0_i32_0 = arith.constant 0 : i32
    return %arg0, %c0_i32, %arg1 : i32, i32, i32
  }
}

</mosaic_0001>

<bundles_post_ra>
// kernel: tpu_custom_call.1
= control target key start
LH: loop header
LB: loop body
LE: loop exit
PB: predicated region body
PF: predicated region fallthrough
CT: control target
= control target key end

     0   :  { %7 = vsyncpa [#allocation3], 0  ;;  %s478_s0 = inlined_call_operand.hbm [shape: f32[2,8,32], index: 0, kind: input, shape index: {}]   ;;  %s479_s1 = inlined_call_operand.hbm [shape: f32[32,32], index: 1, kind: input, shape index: {}]   ;;  %s480_s2 = inlined_call_operand.vmem [shape: bf16[2,32,8], index: 2, kind: output, shape index: {}]  }
   0x1   :  { %8 = vsyncpa [#allocation5], 0  ;;  %s391_s9 = smov [#allocation2]   ;;  %s343_s13 = scalar_lea.hbm %s478_s0, 256 }
   0x2   :  { %s14_s10 = sshll.u32 %s391_s9, 4  ;;  %p344_p0 = scmp.ne.s32.totalorder %s478_s0, %s343_s13  ;;  %s15_s10 = int_to_ptr.vmem [resolvable:$true] %s14_s10 }
   0x3   :  { %p347_p1 = scmp.lt.u32.totalorder %s343_s13, %s478_s0 }
   0x5   :  { %p349_p2 = pnand %p347_p1, %p344_p0 }
   0x7   :  { %352 = shalt.err (!%p349_p2)
}
   0x8   :  { %s353_s18 = scalar_lea.vmem %s15_s10, 256  ;;  %p358_p4 = scmp.lt.s32.totalorder %s15_s10, %s15_s10 }
   0x9   :  { %p354_p3 = scmp.ne.s32.totalorder %s15_s10, %s353_s18  ;;  %p359_p5 = scmp.lt.s32.totalorder %s353_s18, %s353_s18 }
   0xb   :  { %p360_p6 = por %p359_p5, %p358_p4 }
   0xd   :  { %p361_p7 = pnand %p360_p6, %p354_p3 }
   0xf   :  { %364 = shalt.err (!%p361_p7)
}
  0x10   :  { %s392_s19 = smov 128   ;;  %s393_s20 = smov 8  }
  0x11   :  { %20 = dma.hbm_to_vmem [thread:$0]  %s478_s0, 256, %s15_s10, [#allocation3], %s392_s19, %s392_s19, %s393_s20  }
  0x12   :  { %s394_s23 = smov [#allocation4]   ;;  %s365_s27 = scalar_lea.hbm %s479_s1, 512 }
  0x13   :  { %s26_s24 = sshll.u32 %s394_s23, 4  ;;  %p366_p8 = scmp.ne.s32.totalorder %s479_s1, %s365_s27  ;;  %s27_s24 = int_to_ptr.vmem [resolvable:$true] %s26_s24 }
  0x14   :  { %p369_p9 = scmp.lt.u32.totalorder %s365_s27, %s479_s1 }
  0x16   :  { %p371_p10 = pnand %p369_p9, %p366_p8 }
  0x18   :  { %374 = shalt.err (!%p371_p10)
}
  0x19   :  { %s375_s4 = scalar_lea.vmem %s27_s24, 512  ;;  %p380_p12 = scmp.lt.s32.totalorder %s27_s24, %s27_s24 }
  0x1a   :  { %p376_p11 = scmp.ne.s32.totalorder %s27_s24, %s375_s4  ;;  %p381_p13 = scmp.lt.s32.totalorder %s375_s4, %s375_s4 }
  0x1c   :  { %p382_p0 = por %p381_p13, %p380_p12 }
  0x1e   :  { %p383_p1 = pnand %p382_p0, %p376_p11 }
  0x20   :  { %386 = shalt.err (!%p383_p1)
}
  0x21   :  { %32 = dma.hbm_to_vmem [thread:$0]  %s479_s1, 512, %s27_s24, [#allocation5], %s392_s19, %s392_s19, %s393_s20  }
  0x22   :  { %387 = dma.done.wait [#allocation3], 256  }
  0x23   :  { %388 = vsyncadd [#allocation3], 4294967040 }
  0x24   :  { %389 = dma.done.wait [#allocation5], 512  }
  0x25   :  { %390 = vsyncadd [#allocation5], 4294966784  ;;  %vm44_vm0 = vcmask 261120   ;;  %v43_v0 = vld [vmem:[#allocation2] sm:$0xff]  ;;  %v167_v1 = vld [vmem:[#allocation2 + $0x8] sm:$0xff]  ;;  %vm161_vm1 = vcmask 60416  }
  0x26   :  { %v39_v2 = vld [vmem:[#allocation4] sm:$0xff]  ;;  %323 = vmatprep.subr.msk.mxu0 %vm44_vm0, %v43_v0  ;;  %331 = vmatprep.subr.msk.mxu1 %vm44_vm0, %v167_v1  ;;  %v40_v3 = vld [vmem:[#allocation4 + $0x8] sm:$0xff]  ;;  %v41_v4 = vld [vmem:[#allocation4 + $0x10] sm:$0xff] }
  0x27   :  { %324 = vmatpush3.xpose.msk.msra.mxu0 %vm44_vm0, %v43_v0  ;;  %332 = vmatpush3.xpose.msk.msra.mxu1 %vm44_vm0, %v167_v1  ;;  %v42_v5 = vld [vmem:[#allocation4 + $0x18] sm:$0xff] }
  0x28   :  { %325 = vmatprep.mubr.msk.f32.mxu0 %vm44_vm0, %v39_v2  ;;  %333 = vmatprep.mubr.msk.f32.mxu1 %vm44_vm0, %v39_v2 }
  0x2a   :  { %326 = vmatmul.mubr.msk.f32.vlgmr.msra.gmra.mrb[0].mxu0 %vm44_vm0, %v40_v3  ;;  %334 = vmatmul.mubr.msk.f32.vlgmr.msra.gmra.mrb[0].mxu1 %vm44_vm0, %v40_v3 }
  0x2b   :  { %328 = vmatprep.mubr.msk.f32.mxu0 %vm44_vm0, %v41_v4  ;;  %336 = vmatprep.mubr.msk.f32.mxu1 %vm44_vm0, %v41_v4 }
  0x2e   :  { %329 = vmatmul.mubr.msk.f32.gmra.mrb[2].mxu0 %vm44_vm0, %v42_v5  ;;  %337 = vmatmul.mubr.msk.f32.gmra.mrb[2].mxu1 %vm44_vm0, %v42_v5 }
  0xfd   :  { %v327_v6 = vpop.f32.mrb[0].mxu0  ;;  %v335_v7 = vpop.f32.mrb[0].mxu1 }
  0xfe   :  { %v306_v8 = vpack.c.bf16 %v327_v6, %v327_v6  ;;  %v310_v9 = vpack.c.bf16 %v335_v7, %v335_v7  ;;  %v126_v10 = vpop.f32.mrb[1].mxu0  ;;  %v237_v11 = vpop.f32.mrb[1].mxu1 }
  0xff   :  { %v305_v12 = vpack.c.bf16 %v126_v10, %v126_v10  ;;  %v309_v13 = vpack.c.bf16 %v237_v11, %v237_v11 }
 0x100   :  { %163 = vst.msk [vmem:[%s480_s2 + $0x4] sm:$0xf] %vm161_vm1, %v306_v8  ;;  %302 = vst.msk [vmem:[%s480_s2 + $0x14] sm:$0xf] %vm161_vm1, %v310_v9 }
 0x101   :  { %162 = vst.msk [vmem:[%s480_s2] sm:$0xf] %vm161_vm1, %v305_v12  ;;  %301 = vst.msk [vmem:[%s480_s2 + $0x10] sm:$0xf] %vm161_vm1, %v309_v13  ;;  %v330_v14 = vpop.f32.mrb[2].mxu0  ;;  %v338_v15 = vpop.f32.mrb[2].mxu1 }
 0x102   :  { %v308_v16 = vpack.c.bf16 %v330_v14, %v330_v14  ;;  %v312_v17 = vpack.c.bf16 %v338_v15, %v338_v15  ;;  %v136_v18 = vpop.f32.mrb[3].mxu0  ;;  %v247_v19 = vpop.f32.mrb[3].mxu1 }
 0x103   :  { %v307_v20 = vpack.c.bf16 %v136_v18, %v136_v18  ;;  %v311_v21 = vpack.c.bf16 %v247_v19, %v247_v19 }
 0x104   :  { %165 = vst.msk [vmem:[%s480_s2 + $0xc] sm:$0xf] %vm161_vm1, %v308_v16  ;;  %304 = vst.msk [vmem:[%s480_s2 + $0x1c] sm:$0xf] %vm161_vm1, %v312_v17 }
 0x105   :  { %164 = vst.msk [vmem:[%s480_s2 + $0x8] sm:$0xf] %vm161_vm1, %v307_v20  ;;  %303 = vst.msk [vmem:[%s480_s2 + $0x18] sm:$0xf] %vm161_vm1, %v311_v21 }
 0x106   :  { %281 = vsyncpa [#allocation3], 1 }
 0x107   :  { %282 = vsyncpa [#allocation5], 1 }

</bundles_post_ra>
